<compile_context>
chip_gen: v5e
topology: v5e:2x2
jax: 0.10.0
libtpu: 0.0.40
codegen_flags: <defaults>
</compile_context>

<pallas_src>
import functools

import numpy as np
import jax
import jax.numpy as jnp
from jax.experimental import pallas as pl
from jax.experimental.pallas import tpu as pltpu


_VMEM = pl.BlockSpec(memory_space=pltpu.MemorySpace.VMEM)


# --------------------------------------------------------------------------
# Fused Pallas kernel
# --------------------------------------------------------------------------

def _fused_kernel(x_ref, wb1_ref, b1_ref, m1_ref, wb2_ref, g_ref, whb_ref,
                  bhb_ref, mask1_ref, y1h_ref,
                  head_ref, loss_ref,
                  *, N, V, inv_cnt):
    K = wb1_ref.shape[0]
    R1 = mask1_ref.shape[0]     # conv1 "full-row" output rows (incl. garbage)
    R2 = g_ref.shape[1]         # conv2 "full-row" output rows (incl. garbage)

    # ---- Conv1: K row-shifted whole-batch matmuls (x is (N*H, W*Cin) bf16).
    # Rows straddling an image boundary are garbage; they are masked from the
    # BN statistics and never reach GAP.
    acc1 = jnp.dot(x_ref[0:R1, :], wb1_ref[0],
                   preferred_element_type=jnp.float32)
    for kh in range(1, K):
        acc1 = acc1 + jnp.dot(x_ref[kh:kh + R1, :], wb1_ref[kh],
                              preferred_element_type=jnp.float32)
    acc1 = acc1 + b1_ref[...]                            # (R1, L1)

    # ---- BatchNorm2d (training-mode batch stats, gamma=1, beta=0, eps=1e-5).
    # Two-pass centered variance; per-channel pooling over the interleaved
    # (wo, c1) lane layout via the 0/1 channel-pool matrix m1 (tiny f32 dot).
    mask = mask1_ref[...]                                # (R1, 1) valid rows
    row_sum = jnp.sum(acc1 * mask, axis=0, keepdims=True)            # (1, L1)
    mean_l = jnp.dot(row_sum, m1_ref[...],
                     preferred_element_type=jnp.float32) * inv_cnt   # (1, L1)
    cen = acc1 - mean_l
    var_sum = jnp.sum(cen * cen * mask, axis=0, keepdims=True)
    var_l = jnp.dot(var_sum, m1_ref[...],
                    preferred_element_type=jnp.float32) * inv_cnt
    scale_l = jax.lax.rsqrt(var_l + 1e-5)
    h1 = cen * scale_l
    h1 = jnp.where(h1 >= 0.0, h1, 0.01 * h1)             # LeakyReLU(0.01)

    # ---- Conv2 (bias folded into the head bias), K row-shifted batch matmuls.
    acc2 = jnp.dot(h1[0:R2, :].astype(jnp.bfloat16), wb2_ref[0],
                   preferred_element_type=jnp.float32)
    for kh in range(1, K):
        acc2 = acc2 + jnp.dot(h1[kh:kh + R2, :].astype(jnp.bfloat16),
                              wb2_ref[kh],
                              preferred_element_type=jnp.float32)    # (R2, L2)

    # ---- GlobalAvgPool (per-image row pooling) as ONE selector matmul; the
    # lane->channel gather, 1/(Ho2*Wo2), Linear(C2->1024), conv2 bias and both
    # classifier heads are all pre-folded into whb/bhb -> ONE head matmul.
    gvec = jnp.dot(g_ref[...], acc2,
                   preferred_element_type=jnp.float32)               # (Np, L2)
    logits = jnp.dot(gvec.astype(jnp.bfloat16), whb_ref[...],
                     preferred_element_type=jnp.float32) + bhb_ref[...]  # (Np,128)
    head_ref[...] = logits                               # one unmasked full store

    # ---- Batched cross_entropy(obj_scores, y): obj classes = columns 1..V.
    col = jax.lax.broadcasted_iota(jnp.int32, logits.shape, 1)
    vcol = jnp.logical_and(col >= 1, col <= V)
    masked = jnp.where(vcol, logits, jnp.float32(-1e30))
    m = jnp.max(masked, axis=1, keepdims=True)                        # (Np, 1)
    ez = jnp.where(vcol, jnp.exp(logits - m), 0.0)
    lse = m + jnp.log(jnp.sum(ez, axis=1, keepdims=True))
    picked = jnp.sum(logits * y1h_ref[...], axis=1, keepdims=True)
    per = (lse - picked)[0:N, :]                         # drop padded batch rows
    loss_ref[...] = jnp.sum(per, axis=0, keepdims=True) * (1.0 / float(N))


# --------------------------------------------------------------------------
# Wrapper
# --------------------------------------------------------------------------

def obj_discriminator_forward(x, y, P, *, Cin=4, C1=8, C2=16, V=10):
    """Pallas implementation of ObjDiscriminator.forward(x, y)."""
    if x.ndim == 3:                                      # x = x[:, None]
        x = x[:, None]
    N, _, H, W = x.shape
    K = 3
    Ho1, Wo1 = H - K + 1, W - K + 1
    Ho2, Wo2 = Ho1 - K + 1, Wo1 - K + 1
    R1 = N * H - (K - 1)
    R2 = R1 - (K - 1)
    Np = max(8, -(-N // 8) * 8)          # head rows padded to a full 8-sublane tile

    # Layout glue: NCHW -> (N*H, W*Cin) bf16, channels lane-minor.
    x2 = jnp.transpose(x, (0, 2, 3, 1)).astype(jnp.bfloat16).reshape(N * H, W * Cin)

    # Structural constants (tiny): BN valid-row mask and per-image GAP selector.
    mask1 = np.zeros((R1, 1), np.float32)
    g = np.zeros((Np, R2), np.float32)
    for n in range(N):
        mask1[n * H:n * H + Ho1, 0] = 1.0
        g[n, n * H:n * H + Ho2] = 1.0

    # Labels as a one-hot over the 128-lane head (obj classes at columns 1..V).
    y1h = jnp.zeros((Np, 128), jnp.float32).at[
        jnp.arange(N), 1 + y.astype(jnp.int32)].set(1.0)

    kern = functools.partial(_fused_kernel, N=N, V=V,
                             inv_cnt=1.0 / float(N * Ho1 * Wo1))
    head, loss = pl.pallas_call(
        kern,
        out_shape=(jax.ShapeDtypeStruct((Np, 128), jnp.float32),
                   jax.ShapeDtypeStruct((1, 1), jnp.float32)),
        in_specs=[_VMEM] * 10,
        out_specs=(_VMEM, _VMEM),
        compiler_params=pltpu.CompilerParams(vmem_limit_bytes=4 * 1024 * 1024),
    )(x2, P['wb1'], P['b1e'], P['m1'], P['wb2'],
      jnp.asarray(g), P['whb'], P['bhb'], jnp.asarray(mask1), y1h)

    real_scores = head[:N, 0:1]                          # (N, 1)
    return real_scores, loss[0, 0]


# --------------------------------------------------------------------------
# Parameter init (raw, PyTorch-like) and packing into kernel-friendly form
# --------------------------------------------------------------------------

def init_params(key, Cin=4, C1=8, C2=16, D_fc=1024, V=10, K=3):
    ks = jax.random.split(key, 10)

    def kaiming(k, shape, fan_in):
        return (jax.random.normal(k, shape, jnp.float32)
                * np.sqrt(2.0 / fan_in)).astype(jnp.float32)

    def lin_init(kw, kb, fan_in, fan_out):
        bound = 1.0 / np.sqrt(fan_in)
        w = jax.random.uniform(kw, (fan_in, fan_out), jnp.float32, -bound, bound)
        b = jax.random.uniform(kb, (1, fan_out), jnp.float32, -bound, bound)
        return w, b

    P = {}
    # Conv weights stored as (K*K*Cin, Cout) in (kh, kw, ci) feature order.
    P['w_c1'] = kaiming(ks[0], (K * K * Cin, C1), K * K * Cin)
    P['b_c1'] = jax.random.uniform(ks[1], (1, C1), jnp.float32,
                                   -1.0 / np.sqrt(K * K * Cin),
                                   1.0 / np.sqrt(K * K * Cin))
    P['w_c2'] = kaiming(ks[2], (K * K * C1, C2), K * K * C1)
    P['b_c2'] = jax.random.uniform(ks[3], (1, C2), jnp.float32,
                                   -1.0 / np.sqrt(K * K * C1),
                                   1.0 / np.sqrt(K * K * C1))
    P['w_fc'], P['b_fc'] = lin_init(ks[4], ks[5], C2, D_fc)
    P['w_real'], P['b_real'] = lin_init(ks[6], ks[7], D_fc, 1)
    P['w_obj'], P['b_obj'] = lin_init(ks[8], ks[9], D_fc, V)
    return P


def pack_params(P, H, W, Cin=4, C1=8, C2=16, V=10, K=3, D_fc=1024):
    """One-time numpy preprocessing of raw params into the packed kernel form."""
    Ho1, Wo1 = H - K + 1, W - K + 1
    Ho2, Wo2 = Ho1 - K + 1, Wo1 - K + 1
    L1, L2 = Wo1 * C1, Wo2 * C2

    def banded(wmat, cin, cout, win, wo):
        # wmat: (K*K*cin, cout), feature order (kh, kw, ci).
        # Wb[kh][(wo+kw)*cin + ci, wo*cout + co] = w[kh, kw, ci, co]
        wb = np.zeros((K, win * cin, wo * cout), np.float32)
        for kh in range(K):
            for kw in range(K):
                blk = wmat[(kh * K + kw) * cin:(kh * K + kw + 1) * cin, :]
                for o in range(wo):
                    wb[kh, (o + kw) * cin:(o + kw + 1) * cin,
                       o * cout:(o + 1) * cout] = blk
        return wb

    w1 = np.asarray(P['w_c1'], np.float32)
    w2 = np.asarray(P['w_c2'], np.float32)
    Wb1 = banded(w1, Cin, C1, W, Wo1)        # (K, W*Cin, L1)
    Wb2 = banded(w2, C1, C2, Wo1, Wo2)       # (K, L1,    L2)

    b1e = np.tile(np.asarray(P['b_c1'], np.float32).reshape(1, C1), (1, Wo1))

    # 0/1 channel-pool matrix for BN stats over the interleaved (wo,c1) lanes.
    lane1 = np.arange(L1)
    m1 = (lane1[:, None] % C1 == lane1[None, :] % C1).astype(np.float32)

    # Fold GAP channel-gather + 1/(Ho2*Wo2) + Linear(C2->1024) + conv2 bias and
    # both classifier heads into ONE (L2, 128) matrix + (1, 128) bias.
    sel2 = np.zeros((L2, C2), np.float32)
    idx = np.arange(L2)
    sel2[idx, idx % C2] = 1.0
    wh_full = np.zeros((D_fc, 128), np.float32)
    wh_full[:, 0:1] = np.asarray(P['w_real'], np.float32)
    wh_full[:, 1:1 + V] = np.asarray(P['w_obj'], np.float32)
    bh_full = np.zeros((1, 128), np.float32)
    bh_full[0, 0] = np.asarray(P['b_real'], np.float32).reshape(-1)[0]
    bh_full[0, 1:1 + V] = np.asarray(P['b_obj'], np.float32).reshape(-1)

    w_fc = np.asarray(P['w_fc'], np.float32)
    b_fc = np.asarray(P['b_fc'], np.float32).reshape(1, D_fc)
    b_c2 = np.asarray(P['b_c2'], np.float32).reshape(1, C2)

    whb = (sel2 @ w_fc @ wh_full) / float(Ho2 * Wo2)        # (L2, 128)
    bhb = (b_c2 @ w_fc + b_fc) @ wh_full + bh_full          # (1, 128)

    return {
        'wb1': jnp.asarray(Wb1, jnp.bfloat16),
        'b1e': jnp.asarray(b1e, jnp.float32),
        'm1': jnp.asarray(m1, jnp.float32),
        'wb2': jnp.asarray(Wb2, jnp.bfloat16),
        'whb': jnp.asarray(whb, jnp.bfloat16),
        'bhb': jnp.asarray(bhb, jnp.float32),
    }


# --------------------------------------------------------------------------
# Pure-JAX f32 reference (same math as the PyTorch module) for the self-check.
# im2col is only used here, NOT in the Pallas path.
# --------------------------------------------------------------------------

def im2col_valid(x_nhwc, K):
    N, H, W, C = x_nhwc.shape
    Ho, Wo = H - K + 1, W - K + 1
    slabs = []
    for kh in range(K):
        for kw in range(K):
            slabs.append(x_nhwc[:, kh:kh + Ho, kw:kw + Wo, :])
    p = jnp.concatenate(slabs, axis=-1)
    return p.reshape(N * Ho * Wo, K * K * C), Ho, Wo


def reference_forward(x_nchw, y, P):
    if x_nchw.ndim == 3:
        x_nchw = x_nchw[:, None]
    N = x_nchw.shape[0]
    x = jnp.transpose(x_nchw, (0, 2, 3, 1)).astype(jnp.float32)

    p1, Ho1, Wo1 = im2col_valid(x, 3)
    h1 = p1 @ P['w_c1'] + P['b_c1']
    mean = jnp.mean(h1, axis=0, keepdims=True)
    var = jnp.mean(jnp.square(h1 - mean), axis=0, keepdims=True)
    h1 = (h1 - mean) * jax.lax.rsqrt(var + 1e-5)
    h1 = jnp.where(h1 >= 0.0, h1, 0.01 * h1)
    h1 = h1.reshape(N, Ho1, Wo1, P['w_c1'].shape[1])

    p2, Ho2, Wo2 = im2col_valid(h1, 3)
    h2 = p2 @ P['w_c2'] + P['b_c2']
    h2 = h2.reshape(N, Ho2 * Wo2, P['w_c2'].shape[1])

    vecs0 = jnp.mean(h2, axis=1)
    vecs = vecs0 @ P['w_fc'] + P['b_fc']
    real = vecs @ P['w_real'] + P['b_real']
    obj = vecs @ P['w_obj'] + P['b_obj']
    lse = jax.scipy.special.logsumexp(obj, axis=1)
    picked = obj[jnp.arange(N), y]
    loss = jnp.mean(lse - picked)
    return real, loss


# --------------------------------------------------------------------------

if __name__ == "__main__":
    key = jax.random.PRNGKey(0)
    k_x, k_y, k_p = jax.random.split(key, 3)

    vocab = {'object_idx_to_name': ['obj%d' % i for i in range(10)]}
    V = len(vocab['object_idx_to_name'])

    N, Cin, H, W = 2, 4, 16, 16
    C1, C2, D_fc = 8, 16, 1024

    x = jax.random.normal(k_x, (N, Cin, H, W), jnp.float32)      # NCHW, like PyTorch
    y = jax.random.randint(k_y, (N,), 0, V)

    raw = init_params(k_p, Cin=Cin, C1=C1, C2=C2, D_fc=D_fc, V=V)
    packed = pack_params(raw, H=H, W=W, Cin=Cin, C1=C1, C2=C2, V=V, D_fc=D_fc)

    real_scores, ac_loss = obj_discriminator_forward(
        x, y, packed, Cin=Cin, C1=C1, C2=C2, V=V)
    jax.block_until_ready((real_scores, ac_loss))

    with jax.default_matmul_precision("highest"):
        ref_real, ref_loss = reference_forward(x, y, raw)
        ref_real, ref_loss = jax.block_until_ready((ref_real, ref_loss))

    np.testing.assert_allclose(np.asarray(real_scores), np.asarray(ref_real),
                               rtol=5e-2, atol=5e-2)
    np.testing.assert_allclose(float(ac_loss), float(ref_loss),
                               rtol=5e-2, atol=5e-2)

    print("KERNEL_OK")
</pallas_src>

<mosaic_0001>
module attributes {stable_mosaic.version = 11 : i64} {
  func.func @_fused_kernel(%arg0: memref<32x64xbf16, #tpu.memory_space<vmem>>, %arg1: memref<3x64x112xbf16, #tpu.memory_space<vmem>>, %arg2: memref<1x112xf32, #tpu.memory_space<vmem>>, %arg3: memref<112x112xf32, #tpu.memory_space<vmem>>, %arg4: memref<3x112x192xbf16, #tpu.memory_space<vmem>>, %arg5: memref<8x28xf32, #tpu.memory_space<vmem>>, %arg6: memref<192x128xbf16, #tpu.memory_space<vmem>>, %arg7: memref<1x128xf32, #tpu.memory_space<vmem>>, %arg8: memref<30x1xf32, #tpu.memory_space<vmem>>, %arg9: memref<8x128xf32, #tpu.memory_space<vmem>>, %arg10: memref<8x128xf32, #tpu.memory_space<vmem>>, %arg11: memref<1x1xf32, #tpu.memory_space<vmem>>) attributes {dimension_semantics = [], scalar_prefetch = 0 : i64, scratch_operands = 0 : i64, tpu.core_type = #tpu.core_type<tc>} {
    %c0 = arith.constant 0 : index
    %c0_0 = arith.constant 0 : index
    %0 = vector.load %arg0[%c0, %c0_0] : memref<32x64xbf16, #tpu.memory_space<vmem>>, vector<30x64xbf16>
    %c0_1 = arith.constant 0 : index
    %c0_2 = arith.constant 0 : index
    %c0_3 = arith.constant 0 : index
    %1 = vector.load %arg1[%c0_1, %c0_2, %c0_3] : memref<3x64x112xbf16, #tpu.memory_space<vmem>>, vector<1x64x112xbf16>
    %2 = vector.shape_cast %1 : vector<1x64x112xbf16> to vector<64x112xbf16>
    %cst = arith.constant dense<0.000000e+00> : vector<30x112xf32>
    %3 = tpu.matmul %0, %2, %cst {dimension_numbers = #tpu.dot_dimension_numbers<[1], [0], [0], [1], [0, 0, 1, 1], [], []>} : vector<30x64xbf16>, vector<64x112xbf16>, vector<30x112xf32> -> vector<30x112xf32>
    %c1 = arith.constant 1 : index
    %c0_4 = arith.constant 0 : index
    %4 = vector.load %arg0[%c1, %c0_4] : memref<32x64xbf16, #tpu.memory_space<vmem>>, vector<30x64xbf16>
    %c1_5 = arith.constant 1 : index
    %c0_6 = arith.constant 0 : index
    %c0_7 = arith.constant 0 : index
    %5 = vector.load %arg1[%c1_5, %c0_6, %c0_7] : memref<3x64x112xbf16, #tpu.memory_space<vmem>>, vector<1x64x112xbf16>
    %6 = vector.shape_cast %5 : vector<1x64x112xbf16> to vector<64x112xbf16>
    %cst_8 = arith.constant dense<0.000000e+00> : vector<30x112xf32>
    %7 = tpu.matmul %4, %6, %cst_8 {dimension_numbers = #tpu.dot_dimension_numbers<[1], [0], [0], [1], [0, 0, 1, 1], [], []>} : vector<30x64xbf16>, vector<64x112xbf16>, vector<30x112xf32> -> vector<30x112xf32>
    %8 = arith.addf %3, %7 : vector<30x112xf32>
    %c2 = arith.constant 2 : index
    %c0_9 = arith.constant 0 : index
    %9 = vector.load %arg0[%c2, %c0_9] : memref<32x64xbf16, #tpu.memory_space<vmem>>, vector<30x64xbf16>
    %c2_10 = arith.constant 2 : index
    %c0_11 = arith.constant 0 : index
    %c0_12 = arith.constant 0 : index
    %10 = vector.load %arg1[%c2_10, %c0_11, %c0_12] : memref<3x64x112xbf16, #tpu.memory_space<vmem>>, vector<1x64x112xbf16>
    %11 = vector.shape_cast %10 : vector<1x64x112xbf16> to vector<64x112xbf16>
    %cst_13 = arith.constant dense<0.000000e+00> : vector<30x112xf32>
    %12 = tpu.matmul %9, %11, %cst_13 {dimension_numbers = #tpu.dot_dimension_numbers<[1], [0], [0], [1], [0, 0, 1, 1], [], []>} : vector<30x64xbf16>, vector<64x112xbf16>, vector<30x112xf32> -> vector<30x112xf32>
    %13 = arith.addf %8, %12 : vector<30x112xf32>
    %c0_14 = arith.constant 0 : index
    %c0_15 = arith.constant 0 : index
    %14 = vector.load %arg2[%c0_14, %c0_15] : memref<1x112xf32, #tpu.memory_space<vmem>>, vector<1x112xf32>
    %15 = vector.broadcast %14 : vector<1x112xf32> to vector<30x112xf32>
    %16 = arith.addf %13, %15 : vector<30x112xf32>
    %c0_16 = arith.constant 0 : index
    %c0_17 = arith.constant 0 : index
    %17 = vector.load %arg8[%c0_16, %c0_17] : memref<30x1xf32, #tpu.memory_space<vmem>>, vector<30x1xf32>
    %18 = vector.broadcast %17 : vector<30x1xf32> to vector<30x112xf32>
    %19 = arith.mulf %16, %18 : vector<30x112xf32>
    %cst_18 = arith.constant dense<0.000000e+00> : vector<112xf32>
    %20 = vector.multi_reduction <add>, %19, %cst_18 [0] : vector<30x112xf32> to vector<112xf32>
    %21 = vector.shape_cast %20 : vector<112xf32> to vector<1x112xf32>
    %c0_19 = arith.constant 0 : index
    %c0_20 = arith.constant 0 : index
    %22 = vector.load %arg3[%c0_19, %c0_20] : memref<112x112xf32, #tpu.memory_space<vmem>>, vector<112x112xf32>
    %cst_21 = arith.constant dense<0.000000e+00> : vector<1x112xf32>
    %23 = tpu.matmul %21, %22, %cst_21 {dimension_numbers = #tpu.dot_dimension_numbers<[1], [0], [0], [1], [0, 0, 1, 1], [], []>} : vector<1x112xf32>, vector<112x112xf32>, vector<1x112xf32> -> vector<1x112xf32>
    %cst_22 = arith.constant 0.00255102036 : f32
    %24 = vector.broadcast %cst_22 : f32 to vector<1x112xf32>
    %25 = arith.mulf %23, %24 : vector<1x112xf32>
    %26 = vector.broadcast %25 : vector<1x112xf32> to vector<30x112xf32>
    %27 = arith.subf %16, %26 : vector<30x112xf32>
    %28 = arith.mulf %27, %27 : vector<30x112xf32>
    %29 = vector.broadcast %17 : vector<30x1xf32> to vector<30x112xf32>
    %30 = arith.mulf %28, %29 : vector<30x112xf32>
    %cst_23 = arith.constant dense<0.000000e+00> : vector<112xf32>
    %31 = vector.multi_reduction <add>, %30, %cst_23 [0] : vector<30x112xf32> to vector<112xf32>
    %32 = vector.shape_cast %31 : vector<112xf32> to vector<1x112xf32>
    %c0_24 = arith.constant 0 : index
    %c0_25 = arith.constant 0 : index
    %33 = vector.load %arg3[%c0_24, %c0_25] : memref<112x112xf32, #tpu.memory_space<vmem>>, vector<112x112xf32>
    %cst_26 = arith.constant dense<0.000000e+00> : vector<1x112xf32>
    %34 = tpu.matmul %32, %33, %cst_26 {dimension_numbers = #tpu.dot_dimension_numbers<[1], [0], [0], [1], [0, 0, 1, 1], [], []>} : vector<1x112xf32>, vector<112x112xf32>, vector<1x112xf32> -> vector<1x112xf32>
    %cst_27 = arith.constant 0.00255102036 : f32
    %35 = vector.broadcast %cst_27 : f32 to vector<1x112xf32>
    %36 = arith.mulf %34, %35 : vector<1x112xf32>
    %cst_28 = arith.constant 9.99999974E-6 : f32
    %37 = vector.broadcast %cst_28 : f32 to vector<1x112xf32>
    %38 = arith.addf %36, %37 : vector<1x112xf32>
    %39 = math.rsqrt %38 : vector<1x112xf32>
    %40 = vector.broadcast %39 : vector<1x112xf32> to vector<30x112xf32>
    %41 = arith.mulf %27, %40 : vector<30x112xf32>
    %cst_29 = arith.constant 0.000000e+00 : f32
    %42 = vector.broadcast %cst_29 : f32 to vector<30x112xf32>
    %43 = arith.cmpf oge, %41, %42 : vector<30x112xf32>
    %cst_30 = arith.constant 0.00999999977 : f32
    %44 = vector.broadcast %cst_30 : f32 to vector<30x112xf32>
    %45 = arith.mulf %44, %41 : vector<30x112xf32>
    %46 = arith.select %43, %41, %45 : vector<30x112xi1>, vector<30x112xf32>
    %47 = vector.extract_strided_slice %46 {offsets = [0, 0], sizes = [28, 112], strides = [1, 1]} : vector<30x112xf32> to vector<28x112xf32>
    %48 = arith.truncf %47 : vector<28x112xf32> to vector<28x112xbf16>
    %c0_31 = arith.constant 0 : index
    %c0_32 = arith.constant 0 : index
    %c0_33 = arith.constant 0 : index
    %49 = vector.load %arg4[%c0_31, %c0_32, %c0_33] : memref<3x112x192xbf16, #tpu.memory_space<vmem>>, vector<1x112x192xbf16>
    %50 = vector.shape_cast %49 : vector<1x112x192xbf16> to vector<112x192xbf16>
    %cst_34 = arith.constant dense<0.000000e+00> : vector<28x192xf32>
    %51 = tpu.matmul %48, %50, %cst_34 {dimension_numbers = #tpu.dot_dimension_numbers<[1], [0], [0], [1], [0, 0, 1, 1], [], []>} : vector<28x112xbf16>, vector<112x192xbf16>, vector<28x192xf32> -> vector<28x192xf32>
    %52 = vector.extract_strided_slice %46 {offsets = [1, 0], sizes = [28, 112], strides = [1, 1]} : vector<30x112xf32> to vector<28x112xf32>
    %53 = arith.truncf %52 : vector<28x112xf32> to vector<28x112xbf16>
    %c1_35 = arith.constant 1 : index
    %c0_36 = arith.constant 0 : index
    %c0_37 = arith.constant 0 : index
    %54 = vector.load %arg4[%c1_35, %c0_36, %c0_37] : memref<3x112x192xbf16, #tpu.memory_space<vmem>>, vector<1x112x192xbf16>
    %55 = vector.shape_cast %54 : vector<1x112x192xbf16> to vector<112x192xbf16>
    %cst_38 = arith.constant dense<0.000000e+00> : vector<28x192xf32>
    %56 = tpu.matmul %53, %55, %cst_38 {dimension_numbers = #tpu.dot_dimension_numbers<[1], [0], [0], [1], [0, 0, 1, 1], [], []>} : vector<28x112xbf16>, vector<112x192xbf16>, vector<28x192xf32> -> vector<28x192xf32>
    %57 = arith.addf %51, %56 : vector<28x192xf32>
    %58 = vector.extract_strided_slice %46 {offsets = [2, 0], sizes = [28, 112], strides = [1, 1]} : vector<30x112xf32> to vector<28x112xf32>
    %59 = arith.truncf %58 : vector<28x112xf32> to vector<28x112xbf16>
    %c2_39 = arith.constant 2 : index
    %c0_40 = arith.constant 0 : index
    %c0_41 = arith.constant 0 : index
    %60 = vector.load %arg4[%c2_39, %c0_40, %c0_41] : memref<3x112x192xbf16, #tpu.memory_space<vmem>>, vector<1x112x192xbf16>
    %61 = vector.shape_cast %60 : vector<1x112x192xbf16> to vector<112x192xbf16>
    %cst_42 = arith.constant dense<0.000000e+00> : vector<28x192xf32>
    %62 = tpu.matmul %59, %61, %cst_42 {dimension_numbers = #tpu.dot_dimension_numbers<[1], [0], [0], [1], [0, 0, 1, 1], [], []>} : vector<28x112xbf16>, vector<112x192xbf16>, vector<28x192xf32> -> vector<28x192xf32>
    %63 = arith.addf %57, %62 : vector<28x192xf32>
    %c0_43 = arith.constant 0 : index
    %c0_44 = arith.constant 0 : index
    %64 = vector.load %arg5[%c0_43, %c0_44] : memref<8x28xf32, #tpu.memory_space<vmem>>, vector<8x28xf32>
    %cst_45 = arith.constant dense<0.000000e+00> : vector<8x192xf32>
    %65 = tpu.matmul %64, %63, %cst_45 {dimension_numbers = #tpu.dot_dimension_numbers<[1], [0], [0], [1], [0, 0, 1, 1], [], []>} : vector<8x28xf32>, vector<28x192xf32>, vector<8x192xf32> -> vector<8x192xf32>
    %66 = arith.truncf %65 : vector<8x192xf32> to vector<8x192xbf16>
    %c0_46 = arith.constant 0 : index
    %c0_47 = arith.constant 0 : index
    %67 = vector.load %arg6[%c0_46, %c0_47] : memref<192x128xbf16, #tpu.memory_space<vmem>>, vector<192x128xbf16>
    %cst_48 = arith.constant dense<0.000000e+00> : vector<8x128xf32>
    %68 = tpu.matmul %66, %67, %cst_48 {dimension_numbers = #tpu.dot_dimension_numbers<[1], [0], [0], [1], [0, 0, 1, 1], [], []>} : vector<8x192xbf16>, vector<192x128xbf16>, vector<8x128xf32> -> vector<8x128xf32>
    %c0_49 = arith.constant 0 : index
    %c0_50 = arith.constant 0 : index
    %69 = vector.load %arg7[%c0_49, %c0_50] : memref<1x128xf32, #tpu.memory_space<vmem>>, vector<1x128xf32>
    %70 = vector.broadcast %69 : vector<1x128xf32> to vector<8x128xf32>
    %71 = arith.addf %68, %70 : vector<8x128xf32>
    %c0_51 = arith.constant 0 : index
    %c0_52 = arith.constant 0 : index
    %72 = vector.load %arg10[%c0_51, %c0_52] : memref<8x128xf32, #tpu.memory_space<vmem>>, vector<8x128xf32>
    tpu.vector_store %arg10[%c0_51, %c0_52], %71 {strides = array<i32>} : memref<8x128xf32, #tpu.memory_space<vmem>>, vector<8x128xf32>,
    %73 = tpu.iota {dimensions = array<i32: 1>} : vector<8x128xi32>
    %c1_i32 = arith.constant 1 : i32
    %74 = vector.broadcast %c1_i32 : i32 to vector<8x128xi32>
    %75 = arith.cmpi sge, %73, %74 : vector<8x128xi32>
    %c10_i32 = arith.constant 10 : i32
    %76 = vector.broadcast %c10_i32 : i32 to vector<8x128xi32>
    %77 = arith.cmpi sle, %73, %76 : vector<8x128xi32>
    %78 = arith.andi %75, %77 : vector<8x128xi1>
    %cst_53 = arith.constant -1.000000e+30 : f32
    %79 = vector.broadcast %cst_53 : f32 to vector<8x128xf32>
    %80 = arith.select %78, %71, %79 : vector<8x128xi1>, vector<8x128xf32>
    %cst_54 = arith.constant dense<0xFF800000> : vector<8xf32>
    %81 = vector.multi_reduction <maximumf>, %80, %cst_54 [1] : vector<8x128xf32> to vector<8xf32>
    %82 = vector.shape_cast %81 : vector<8xf32> to vector<8x1xf32>
    %83 = vector.broadcast %82 : vector<8x1xf32> to vector<8x128xf32>
    %84 = arith.subf %71, %83 : vector<8x128xf32>
    %85 = math.exp %84 : vector<8x128xf32>
    %cst_55 = arith.constant 0.000000e+00 : f32
    %86 = vector.broadcast %cst_55 : f32 to vector<8x128xf32>
    %87 = arith.select %78, %85, %86 : vector<8x128xi1>, vector<8x128xf32>
    %cst_56 = arith.constant dense<0.000000e+00> : vector<8xf32>
    %88 = vector.multi_reduction <add>, %87, %cst_56 [1] : vector<8x128xf32> to vector<8xf32>
    %89 = vector.shape_cast %88 : vector<8xf32> to vector<8x1xf32>
    %90 = math.log %89 : vector<8x1xf32>
    %91 = arith.addf %82, %90 : vector<8x1xf32>
    %c0_57 = arith.constant 0 : index
    %c0_58 = arith.constant 0 : index
    %92 = vector.load %arg9[%c0_57, %c0_58] : memref<8x128xf32, #tpu.memory_space<vmem>>, vector<8x128xf32>
    %93 = arith.mulf %71, %92 : vector<8x128xf32>
    %cst_59 = arith.constant dense<0.000000e+00> : vector<8xf32>
    %94 = vector.multi_reduction <add>, %93, %cst_59 [1] : vector<8x128xf32> to vector<8xf32>
    %95 = vector.shape_cast %94 : vector<8xf32> to vector<8x1xf32>
    %96 = arith.subf %91, %95 : vector<8x1xf32>
    %97 = vector.extract_strided_slice %96 {offsets = [0, 0], sizes = [2, 1], strides = [1, 1]} : vector<8x1xf32> to vector<2x1xf32>
    %cst_60 = arith.constant dense<0.000000e+00> : vector<1xf32>
    %98 = vector.multi_reduction <add>, %97, %cst_60 [0] : vector<2x1xf32> to vector<1xf32>
    %99 = vector.shape_cast %98 : vector<1xf32> to vector<1x1xf32>
    %cst_61 = arith.constant 5.000000e-01 : f32
    %100 = vector.broadcast %cst_61 : f32 to vector<1x1xf32>
    %101 = arith.mulf %99, %100 : vector<1x1xf32>
    %c0_62 = arith.constant 0 : index
    %c0_63 = arith.constant 0 : index
    %102 = vector.load %arg11[%c0_62, %c0_63] : memref<1x1xf32, #tpu.memory_space<vmem>>, vector<1x1xf32>
    tpu.vector_store %arg11[%c0_62, %c0_63], %101 {strides = array<i32>} : memref<1x1xf32, #tpu.memory_space<vmem>>, vector<1x1xf32>,
    return
  }
}

</mosaic_0001>

<bundles_post_ra>
// kernel: tpu_custom_call.1
= control target key start
LH: loop header
LB: loop body
LE: loop exit
PB: predicated region body
PF: predicated region fallthrough
CT: control target
= control target key end

     0   :  { %17 = vsyncpa [#allocation3], 0  ;;  %v1572_v6 = vmov 0   ;;  %s2110_s0 = inlined_call_operand.vmem [shape: bf16[32,64], index: 0, kind: input, shape index: {}]   ;;  %s2111_s1 = inlined_call_operand.vmem [shape: bf16[3,64,112], index: 1, kind: input, shape index: {}]   ;;  %s2112_s2 = inlined_call_operand.vmem [shape: f32[1,112], index: 2, kind: input, shape index: {}]   ;;  %s2113_s3 = inlined_call_operand.vmem [shape: f32[112,112], index: 3, kind: input, shape index: {}]   ;;  %s2114_s4 = inlined_call_operand.vmem [shape: bf16[3,112,192], index: 4, kind: input, shape index: {}]   ;;  %s2115_s5 = inlined_call_operand.vmem [shape: f32[8,28], index: 5, kind: input, shape index: {}]   ;;  %s2116_s6 = inlined_call_operand.vmem [shape: bf16[192,128], index: 6, kind: input, shape index: {}]   ;;  %s2117_s7 = inlined_call_operand.vmem [shape: f32[1,128], index: 7, kind: input, shape index: {}]   ;;  %s2118_s8 = inlined_call_operand.vmem [shape: f32[30,1], index: 8, kind: input, shape index: {}]   ;;  %s2119_s9 = inlined_call_operand.vmem [shape: f32[8,128], index: 9, kind: input, shape index: {}]   ;;  %s2120_s10 = inlined_call_operand.hbm [shape: f32[8,128], index: 10, kind: output, shape index: {0}]   ;;  %s2121_s11 = inlined_call_operand.hbm [shape: f32[1,1], index: 11, kind: output, shape index: {1}]  }
   0x1   :  { %v1429_v0 = vld [vmem:[%s2111_s1 + $0x38] sm:$0xff]  ;;  %v1428_v3 = vld [vmem:[%s2111_s1 + $0x30] sm:$0xff]  ;;  %1505 = vset.pattern.permute.xlu0 %v1572_v6  ;;  %v1489_v7 = vld [vmem:[%s2110_s0] sm:$0xff]   ;;  %1506 = vset.pattern.permute.xlu1 %v1572_v6 }
   0x2   :  { %v1425_v1 = vld [vmem:[%s2111_s1 + $0x18] sm:$0xff]  ;;  %123 = vmatpush.bf16.msra.mxu0 %v1429_v0  ;;  %v1424_v4 = vld [vmem:[%s2111_s1 + $0x10] sm:$0xff]  ;;  %v42_v8 = vld [vmem:[%s2110_s0 + $0x8] sm:$0xff]   ;;  %v76_v12 = vshll.u32 %v1489_v7, 16  ;;  %v74_v15 = vshrl.u32 %v1489_v7, 16 }
   0x3   :  { %v1433_v2 = vld [vmem:[%s2111_s1 + $0x58] sm:$0xff]  ;;  %174 = vmatpush.bf16.msra.mxu1 %v1425_v1  ;;  %v1432_v5 = vld [vmem:[%s2111_s1 + $0x50] sm:$0xff]  ;;  %v1517_v9 = vld [vmem:[%s2110_s0 + $0x8] sm:$0xf]  }
   0x4   :  { %240 = vmatpush.bf16.msra.mxu2 %v1433_v2  ;;  %v1492_v10 = vld [vmem:[%s2110_s0] sm:$0xf0]  ;;  %v1427_v11 = vld [vmem:[%s2111_s1 + $0x28] sm:$0xff]  ;;  %v1493_v13 = vld [vmem:[%s2110_s0] sm:$0xe]  ;;  %v78_v19 = vrot.slane %v76_v12, 1 }
   0x5   :  { %v1423_v14 = vld [vmem:[%s2111_s1 + $0x8] sm:$0xff]  ;;  %v267_v16 = vld [vmem:[%s2118_s8] sm:$0xff]  ;;  %v269_v17 = vld [vmem:[%s2118_s8 + $0x10] sm:$0xff]  ;;  %v1494_v20 = vor.u32 %v1493_v13, %v1492_v10 }
   0x6   :  { %124 = vmatpush.bf16.msra.mxu0 %v1428_v3  ;;  %v1431_v18 = vld [vmem:[%s2111_s1 + $0x48] sm:$0xff]  ;;  %273 = vperm.xlu0 %1505, %v267_v16  }
   0x7   :  { %175 = vmatpush.bf16.msra.mxu1 %v1424_v4  ;;  %283 = vperm.xlu1 %1506, %v269_v17  }
   0x8   :  { %241 = vmatpush.bf16.msra.mxu2 %v1432_v5 }
   0x9   :  { %18 = vsyncpa [#allocation5], 0  ;;  %v81_v21 = vshll.u32 %v42_v8, 16  ;;  %v1426_v22 = vld [vmem:[%s2111_s1 + $0x20] sm:$0xff]  ;;  %v79_v24 = vor.u32 %v78_v19, %v74_v15  ;;  %vm72_vm0 = vsmask.f32 7424 }
   0xa   :  { %125 = vmatpush.bf16.msra.mxu0 %v1427_v11  ;;  %v1422_v23 = vld [vmem:[%s2111_s1] sm:$0xff]  ;;  %v203_v27 = vrot.slane %v1494_v20, 1  ;;  %v204_v28 = vrot.slane %v42_v8, 1  ;;  %vm202_vm1 = vcmask 1046528   ;;  %v268_v29 = vld [vmem:[%s2118_s8 + $0x8] sm:$0xff]  ;;  %vm112_vm2 = vcmask 523264  }
   0xb   :  { %176 = vmatpush.bf16.msra.mxu1 %v1423_v14  ;;  %v1430_v25 = vld [vmem:[%s2111_s1 + $0x40] sm:$0xff]  ;;  %v83_v26 = vrot.slane %v81_v21, 1  ;;  %v270_v30 = vld [vmem:[%s2118_s8 + $0x18] sm:$0x3f]  ;;  %v1571_v33 = vld [vmem:[%s2110_s0 + $0x8] sm:$0x70] }
   0xc   :  { %242 = vmatpush.bf16.msra.mxu2 %v1431_v18  ;;  %v205_v32 = vsel %vm202_vm1, %v203_v27, %v204_v28  ;;  %v85_v34 = vshrl.u32 %v42_v8, 16  ;;  %v1518_v36 = vor.u32 %v1571_v33, %v1517_v9  ;;  %v323_v37 = vld [vmem:[%s2113_s3 + $0x68] sm:$0xff]  ;;  %v322_v38 = vld [vmem:[%s2113_s3 + $0x60] sm:$0xff]  ;;  %v321_v39 = vld [vmem:[%s2113_s3 + $0x58] sm:$0xff]  ;;  %vm295_vm3 = vcmask 916480   ;;  %s1064_s29 = sshll.u32 %s2120_s10, 4  ;;  %s1065_s29 = int_to_ptr.hbm [resolvable:$true] %s1064_s29 }
   0xd   :  { %v84_v31 = vsel %vm72_vm0, %v79_v24, %v83_v26  ;;  %329 = vmatpush.msra.mxu3 %v323_v37  ;;  %v320_v40 = vld [vmem:[%s2113_s3 + $0x50] sm:$0xff]  ;;  %v319_v43 = vld [vmem:[%s2113_s3 + $0x48] sm:$0xff]  ;;  %v318_v44 = vld [vmem:[%s2113_s3 + $0x40] sm:$0xff]  ;;  %vm301_vm4 = vcmask 914432   ;;  %vm845_vm12 = vcmask 1043456   ;;  %vm841_vm13 = vcmask 228352  }
   0xe   :  { %126 = vmatpush.bf16.msra.mxu0 %v1426_v22  ;;  %278 = vperm.xlu0 %1505, %v268_v29   ;;  %v87_v35 = vor.u32 %v85_v34, %v83_v26  ;;  %v317_v45 = vld [vmem:[%s2113_s3 + $0x38] sm:$0xff]  ;;  %v316_v47 = vld [vmem:[%s2113_s3 + $0x30] sm:$0xff]  ;;  %v315_v50 = vld [vmem:[%s2113_s3 + $0x28] sm:$0xff]  ;;  %s1573_s30 = smov [#allocation2]   ;;  %s1574_s10 = smov [#allocation4]  }
   0xf   :  { %177 = vmatpush.bf16.msra.mxu1 %v1422_v23  ;;  %288 = vperm.xlu1 %1506, %v270_v30   ;;  %v314_v51 = vld [vmem:[%s2113_s3 + $0x20] sm:$0xff]  ;;  %v313_v52 = vld [vmem:[%s2113_s3 + $0x18] sm:$0xff]  ;;  %v312_v53 = vld [vmem:[%s2113_s3 + $0x10] sm:$0xff]  ;;  %s1073_s12 = sshll.u32 %s1574_s10, 4  ;;  %s1075_s15 = sshll.u32 %s2121_s11, 4  ;;  %s1074_s12 = int_to_ptr.vmem [resolvable:$true] %s1073_s12  ;;  %s1076_s15 = int_to_ptr.hbm [resolvable:$true] %s1075_s15 }
  0x10   :  { %243 = vmatpush.bf16.msra.mxu2 %v1430_v25  ;;  %330 = vmatpush.msra.mxu3 %v322_v38  ;;  %v311_v56 = vld [vmem:[%s2113_s3 + $0x8] sm:$0xff]  ;;  %v310_v59 = vld [vmem:[%s2113_s3] sm:$0xff] }
  0x11   :  { %1113 = vmatmul.msk.bf16.vlgmr.msra.gmra.mxu0 %vm112_vm2, %v84_v31  ;;  %v1507_v1 = vld [vmem:[%s2112_s2] ss:$0 sm:$0xff] }
  0x12   :  { %1131 = vmatmul.msk.bf16.vlgmr.msra.gmra.mxu1 %vm112_vm2, %v1489_v7  ;;  %379 = vmatpush.msrb.mxu0 %v323_v37 }
  0x13   :  { %1157 = vmatmul.msk.bf16.vlgmr.msra.gmra.mxu2 %vm112_vm2, %v205_v32  ;;  %331 = vmatpush.msra.mxu3 %v321_v39 }
  0x14   :  { %380 = vmatpush.msrb.mxu0 %v322_v38 }
  0x15   :  { %332 = vmatpush.msra.mxu3 %v320_v40 }
  0x16   :  { %381 = vmatpush.msrb.mxu0 %v321_v39 }
  0x17   :  { %333 = vmatpush.msra.mxu3 %v319_v43 }
  0x18   :  { %382 = vmatpush.msrb.mxu0 %v320_v40 }
  0x19   :  { %334 = vmatpush.msra.mxu3 %v318_v44 }
  0x1a   :  { %383 = vmatpush.msrb.mxu0 %v319_v43 }
  0x1b   :  { %335 = vmatpush.msra.mxu3 %v317_v45 }
  0x1c   :  { %384 = vmatpush.msrb.mxu0 %v318_v44 }
  0x1d   :  { %336 = vmatpush.msra.mxu3 %v316_v47 }
  0x1e   :  { %385 = vmatpush.msrb.mxu0 %v317_v45 }
  0x1f   :  { %337 = vmatpush.msra.mxu3 %v315_v50 }
  0x20   :  { %386 = vmatpush.msrb.mxu0 %v316_v47 }
  0x21   :  { %1114 = vmatmul.msk.bf16.gmra.mxu0 %vm112_vm2, %v87_v35  ;;  %338 = vmatpush.msra.mxu3 %v314_v51 }
  0x22   :  { %1132 = vmatmul.msk.bf16.gmra.mxu1 %vm112_vm2, %v1518_v36  ;;  %387 = vmatpush.msrb.mxu0 %v315_v50 }
  0x23   :  { %1158 = vmatmul.msk.bf16.gmra.mxu2 %vm112_vm2, %v204_v28  ;;  %339 = vmatpush.msra.mxu3 %v313_v52 }
  0x24   :  { %388 = vmatpush.msrb.mxu0 %v314_v51 }
  0x25   :  { %340 = vmatpush.msra.mxu3 %v312_v53 }
  0x26   :  { %389 = vmatpush.msrb.mxu0 %v313_v52 }
  0x27   :  { %341 = vmatpush.msra.mxu3 %v311_v56 }
  0x28   :  { %390 = vmatpush.msrb.mxu0 %v312_v53 }
  0x29   :  { %342 = vmatpush.msra.mxu3 %v310_v59 }
  0x2a   :  { %391 = vmatpush.msrb.mxu0 %v311_v56 }
  0x2c   :  { %392 = vmatpush.msrb.mxu0 %v310_v59 }
  0x78   :  { %v1745_v54 = vpop.permute.xlu0 %273 }
  0x79   :  { %v284_v5 = vpop.permute.xlu1 %283 }
  0x80   :  { %v279_v6 = vpop.permute.xlu0 %278 }
  0x81   :  { %v289_v22 = vpop.permute.xlu1 %288 }
  0x8e   :  { %v128_v41 = vpop.f32.mrf.mxu0 }
  0x8f   :  { %v179_v42 = vpop.f32.mrf.mxu1 }
  0x90   :  { %v180_v60 = vadd.f32 %v179_v42, %v128_v41 }
  0x96   :  { %v245_v46 = vpop.f32.mrf.mxu2  ;;  %v130_v48 = vpop.f32.mrf.mxu0 }
  0x97   :  { %v181_v49 = vpop.f32.mrf.mxu1  ;;  %v255_v0 = vadd.f32 %v245_v46, %v180_v60 }
  0x98   :  { %v182_v61 = vadd.f32 %v181_v49, %v130_v48 }
  0x99   :  { %v263_v7 = vadd.f32 %v1507_v1, %v255_v0 }
  0x9b   :  { %v291_v12 = vmul.f32 %v1745_v54, %v263_v7 }
  0x9d   :  { %v296_v18 = vsel %vm295_vm3, %v291_v12, 0.0 }
  0x9e   :  { %v247_v55 = vpop.f32.mrf.mxu2  ;;  %v133_v57 = vpop.f32.mrf.mxu0 }
  0x9f   :  { %v184_v58 = vpop.f32.mrf.mxu1  ;;  %v256_v62 = vadd.f32 %v247_v55, %v182_v61  ;;  %v1285_v61 = vld [vmem:[%s2114_s4 + $0x60] sm:$0xf] }
  0xa0   :  { %v185_v63 = vadd.f32 %v184_v58, %v133_v57 }
  0xa1   :  { %v264_v3 = vadd.f32 %v1507_v1, %v256_v62  ;;  %v1447_v62 = vld [vmem:[%s2114_s4 + $0x64] sm:$0xf0] }
  0xa2   :  { %v1286_v0 = vor.u32 %v1447_v62, %v1285_v61  ;;  %v1452_v61 = vld [vmem:[%s2114_s4 + $0x94] sm:$0xf]  ;;  %v1195_v62 = vld [vmem:[%s2114_s4 + $0x98] sm:$0xf0] }
  0xa3   :  { %v292_v11 = vmul.f32 %v279_v6, %v264_v3 }
  0xa4   :  { %661 = vmatpush.bf16.msrb.mxu3 %v1286_v0  ;;  %v1198_v0 = vor.u32 %v1452_v61, %v1195_v62 }
  0xa5   :  { %v297_v16 = vsel %vm295_vm3, %v292_v11, 0.0  ;;  %v1225_v11 = vld [vmem:[%s2114_s4 + $0xd0] sm:$0xf] }
  0xa6   :  { %v250_v2 = vpop.f32.mrf.mxu2  ;;  %v135_v9 = vpop.f32.mrf.mxu0  ;;  %v298_v21 = vadd.f32 %v297_v16, %v296_v18  ;;  %v1442_v18 = vld [vmem:[%s2114_s4 + $0x44] sm:$0xf] }
  0xa7   :  { %v257_v4 = vadd.f32 %v250_v2, %v185_v63  ;;  %v186_v10 = vpop.f32.mrf.mxu1  ;;  %v1446_v63 = vld [vmem:[%s2114_s4 + $0x64] sm:$0xf] }
  0xa8   :  { %v187_v14 = vadd.f32 %v186_v10, %v135_v9  ;;  %v1460_v9 = vld [vmem:[%s2114_s4 + $0xd4] sm:$0xf]  ;;  %v1227_v10 = vld [vmem:[%s2114_s4 + $0xd8] sm:$0xf0] }
  0xa9   :  { %v265_v8 = vadd.f32 %v1507_v1, %v257_v4  ;;  %v1445_v4 = vld [vmem:[%s2114_s4 + $0x54] sm:$0xf0]  ;;  %v1230_v12 = vor.u32 %v1460_v9, %v1227_v10  ;;  %v1450_v9 = vld [vmem:[%s2114_s4 + $0x84] sm:$0xf]  ;;  %v1187_v10 = vld [vmem:[%s2114_s4 + $0x88] sm:$0xf0] }
  0xab   :  { %v293_v13 = vmul.f32 %v284_v5, %v265_v8  ;;  %568 = vmatpush.bf16.msrb.mxu2 %v1230_v12  ;;  %v1190_v12 = vor.u32 %v1450_v9, %v1187_v10  ;;  %v1463_v9 = vld [vmem:[%s2114_s4 + $0xe4] sm:$0xf0]  ;;  %v1464_v10 = vld [vmem:[%s2114_s4 + $0xf4] sm:$0xf] }
  0xad   :  { %v299_v19 = vsel %vm295_vm3, %v293_v13, 0.0  ;;  %v1461_v13 = vld [vmem:[%s2114_s4 + $0xd4] sm:$0xf0] }
  0xae   :  { %v252_v15 = vpop.f32.mrf.mxu2  ;;  %v300_v24 = vadd.f32 %v299_v19, %v298_v21  ;;  %v1226_v16 = vor.u32 %v1461_v13, %v1225_v11  ;;  %v1271_v19 = vld [vmem:[%s2114_s4 + $0x48] sm:$0xf0]  ;;  %v1458_v21 = vld [vmem:[%s2114_s4 + $0xc4] sm:$0xf]  ;;  %v1185_v11 = vld [vmem:[%s2114_s4 + $0x80] sm:$0xf] }
  0xaf   :  { %v258_v17 = vadd.f32 %v252_v15, %v187_v14  ;;  %v1269_v14 = vld [vmem:[%s2114_s4 + $0x40] sm:$0xf]  ;;  %v1443_v15 = vld [vmem:[%s2114_s4 + $0x44] sm:$0xf0] }
  0xb0   :  { %549 = vmatpush.bf16.msrb.mxu1 %v1226_v16  ;;  %v1451_v13 = vld [vmem:[%s2114_s4 + $0x84] sm:$0xf0] }
  0xb1   :  { %v266_v20 = vadd.f32 %v1507_v1, %v258_v17  ;;  %v1287_v1 = vld [vmem:[%s2114_s4 + $0x68] sm:$0xf0]  ;;  %v1270_v17 = vor.u32 %v1443_v15, %v1269_v14  ;;  %v1186_v14 = vor.u32 %v1451_v13, %v1185_v11  ;;  %v1321_v11 = vld [vmem:[%s2114_s4 + $0xf8] sm:$0xf0] }
  0xb2   :  { %v1290_v2 = vor.u32 %v1446_v63, %v1287_v1  ;;  %v1193_v63 = vld [vmem:[%s2114_s4 + $0x90] sm:$0xf]  ;;  %v1453_v1 = vld [vmem:[%s2114_s4 + $0x94] sm:$0xf0] }
  0xb3   :  { %v294_v23 = vmul.f32 %v289_v22, %v266_v20 }
  0xb4   :  { %680 = vmatpush.bf16.msra.mxu0 %v1290_v2  ;;  %v1237_v2 = vld [vmem:[%s2114_s4] sm:$0xf] }
  0xb5   :  { %v302_v25 = vsel %vm301_vm4, %v294_v23, 0.0  ;;  %v1217_v23 = vld [vmem:[%s2114_s4 + $0xc0] sm:$0xf] }
  0xb6   :  { %v303_v26 = vadd.f32 %v302_v25, %v300_v24  ;;  %v1459_v25 = vld [vmem:[%s2114_s4 + $0xc4] sm:$0xf0] }
  0xb8   :  { %v304_v27 = vrot.slane %v303_v26, 4 }
  0xba   :  { %v305_v28 = vadd.f32 %v304_v27, %v303_v26  ;;  %v1261_v26 = vld [vmem:[%s2114_s4 + $0x30] sm:$0xf]  ;;  %v1441_v27 = vld [vmem:[%s2114_s4 + $0x34] sm:$0xf0] }
  0xbc   :  { %v306_v29 = vrot.slane %v305_v28, 2 }
  0xbe   :  { %v307_v30 = vadd.f32 %v306_v29, %v305_v28  ;;  %v1218_v28 = vor.u32 %v1459_v25, %v1217_v23  ;;  %v1262_v29 = vor.u32 %v1441_v27, %v1261_v26  ;;  %v1475_v25 = vld [vmem:[%s2114_s4 + $0x144] sm:$0xf0]  ;;  %v1351_v27 = vld [vmem:[%s2114_s4 + $0x130] sm:$0xf] }
  0xc0   :  { %v308_v31 = vrot.slane %v307_v30, 1  ;;  %550 = vmatpush.bf16.msrb.mxu1 %v1218_v28  ;;  %v1473_v28 = vld [vmem:[%s2114_s4 + $0x134] sm:$0xf0] }
  0xc2   :  { %v309_v32 = vadd.f32 %v308_v31, %v307_v30  ;;  %v1440_v30 = vld [vmem:[%s2114_s4 + $0x34] sm:$0xf]  ;;  %v1263_v31 = vld [vmem:[%s2114_s4 + $0x38] sm:$0xf0] }
  0xc4   :  { %1159 = vmatmul.msk.f32.vlgmr.msra.gmra.mxu3 %vm295_vm3, %v309_v32  ;;  %v1266_v32 = vor.u32 %v1440_v30, %v1263_v31  ;;  %v1361_v30 = vld [vmem:[%s2114_s4 + $0x148] sm:$0xf0]  ;;  %v1352_v31 = vor.u32 %v1473_v28, %v1351_v27 }
 0x147   :  { %v344_v33 = vpop.f32.mrf.mxu3 }
 0x148   :  { %v347_v34 = vmul.f32 0.0025510204, %v344_v33  ;;  %v1456_v33 = vld [vmem:[%s2114_s4 + $0xb4] sm:$0xf] }
 0x14a   :  { %v348_v35 = vperm.slane %v347_v34, 0  ;;  %v1211_v34 = vld [vmem:[%s2114_s4 + $0xb8] sm:$0xf0] }
 0x14c   :  { %v1762_v36 = vsub.f32 %v263_v7, %v348_v35  ;;  %v1764_v37 = vsub.f32 %v264_v3, %v348_v35  ;;  %v1766_v38 = vsub.f32 %v265_v8, %v348_v35  ;;  %v1768_v39 = vsub.f32 %v266_v20, %v348_v35  ;;  %v1277_v3 = vld [vmem:[%s2114_s4 + $0x50] sm:$0xf]  ;;  %v1279_v7 = vld [vmem:[%s2114_s4 + $0x58] sm:$0xf0] }
 0x14d   :  { %v1274_v20 = vor.u32 %v1442_v18, %v1271_v19  ;;  %v1209_v35 = vld [vmem:[%s2114_s4 + $0xb0] sm:$0xf]  ;;  %v1449_v18 = vld [vmem:[%s2114_s4 + $0x74] sm:$0xf0] }
 0x14e   :  { %v353_v40 = vmul.f32 %v1762_v36, %v1762_v36  ;;  %v354_v41 = vmul.f32 %v1764_v37, %v1764_v37  ;;  %v355_v42 = vmul.f32 %v1766_v38, %v1766_v38  ;;  %v356_v43 = vmul.f32 %v1768_v39, %v1768_v39 }
 0x150   :  { %v357_v44 = vmul.f32 %v353_v40, %v1745_v54  ;;  %v358_v45 = vmul.f32 %v354_v41, %v279_v6  ;;  %v359_v46 = vmul.f32 %v355_v42, %v284_v5  ;;  %v360_v47 = vmul.f32 %v356_v43, %v289_v22  ;;  %v1444_v5 = vld [vmem:[%s2114_s4 + $0x54] sm:$0xf]  ;;  %v1219_v22 = vld [vmem:[%s2114_s4 + $0xc8] sm:$0xf0]  ;;  %v1457_v41 = vld [vmem:[%s2114_s4 + $0xb4] sm:$0xf0] }
 0x151   :  { %v1278_v6 = vor.u32 %v1445_v4, %v1277_v3  ;;  %v1282_v8 = vor.u32 %v1444_v5, %v1279_v7  ;;  %v1222_v24 = vor.u32 %v1458_v21, %v1219_v22  ;;  %v1214_v40 = vor.u32 %v1456_v33, %v1211_v34  ;;  %v1253_v42 = vld [vmem:[%s2114_s4 + $0x20] sm:$0xf]  ;;  %v1439_v43 = vld [vmem:[%s2114_s4 + $0x24] sm:$0xf0]  ;;  %v1239_v7 = vld [vmem:[%s2114_s4 + $0x8] sm:$0xf0] }
 0x152   :  { %v361_v48 = vsel %vm295_vm3, %v357_v44, 0.0  ;;  %v362_v49 = vsel %vm295_vm3, %v358_v45, 0.0  ;;  %v364_v51 = vsel %vm295_vm3, %v359_v46, 0.0  ;;  %v366_v53 = vsel %vm301_vm4, %v360_v47, 0.0  ;;  %v1438_v46 = vld [vmem:[%s2114_s4 + $0x24] sm:$0xf] }
 0x153   :  { %v363_v50 = vadd.f32 %v362_v49, %v361_v48  ;;  %662 = vmatpush.bf16.msrb.mxu3 %v1278_v6  ;;  %681 = vmatpush.bf16.msra.mxu0 %v1282_v8  ;;  %v1210_v44 = vor.u32 %v1457_v41, %v1209_v35  ;;  %v1254_v45 = vor.u32 %v1439_v43, %v1253_v42  ;;  %v1255_v47 = vld [vmem:[%s2114_s4 + $0x28] sm:$0xf0]  ;;  %v1454_v49 = vld [vmem:[%s2114_s4 + $0xa4] sm:$0xf]  ;;  %v1435_v3 = vld [vmem:[%s2114_s4 + $0x4] sm:$0xf0] }
 0x154   :  { %569 = vmatpush.bf16.msrb.mxu2 %v1222_v24  ;;  %v1258_v48 = vor.u32 %v1438_v46, %v1255_v47  ;;  %v1194_v4 = vor.u32 %v1453_v1, %v1193_v63  ;;  %v1238_v5 = vor.u32 %v1435_v3, %v1237_v2  ;;  %v1434_v6 = vld [vmem:[%s2114_s4 + $0x4] sm:$0xf]  ;;  %v1179_v21 = vld [vmem:[%s2114_s4 + $0x78] sm:$0xf0]  ;;  %v1359_v22 = vld [vmem:[%s2114_s4 + $0x140] sm:$0xf] }
 0x155   :  { %v365_v52 = vadd.f32 %v364_v51, %v363_v50  ;;  %551 = vmatpush.bf16.msrb.mxu1 %v1210_v44  ;;  %v1203_v50 = vld [vmem:[%s2114_s4 + $0xa8] sm:$0xf0]  ;;  %v1201_v51 = vld [vmem:[%s2114_s4 + $0xa0] sm:$0xf]  ;;  %v1242_v8 = vor.u32 %v1434_v6, %v1239_v7  ;;  %v1360_v26 = vor.u32 %v1475_v25, %v1359_v22  ;;  %v1471_v34 = vld [vmem:[%s2114_s4 + $0x124] sm:$0xf0] }
 0x156   :  { %v1472_v35 = vld [vmem:[%s2114_s4 + $0x134] sm:$0xf]  ;;  %v1335_v46 = vld [vmem:[%s2114_s4 + $0x110] sm:$0xf]  ;;  %v1469_v47 = vld [vmem:[%s2114_s4 + $0x114] sm:$0xf0] }
 0x157   :  { %v367_v55 = vadd.f32 %v366_v53, %v365_v52  ;;  %663 = vmatpush.bf16.msrb.mxu3 %v1270_v17  ;;  %682 = vmatpush.bf16.msra.mxu0 %v1274_v20  ;;  %v1206_v52 = vor.u32 %v1454_v49, %v1203_v50  ;;  %v1455_v53 = vld [vmem:[%s2114_s4 + $0xa4] sm:$0xf0]  ;;  %v1177_v17 = vld [vmem:[%s2114_s4 + $0x70] sm:$0xf]  ;;  %v1448_v20 = vld [vmem:[%s2114_s4 + $0x74] sm:$0xf]  ;;  %v1336_v49 = vor.u32 %v1469_v47, %v1335_v46 }
 0x158   :  { %570 = vmatpush.bf16.msrb.mxu2 %v1214_v40  ;;  %v1178_v19 = vor.u32 %v1449_v18, %v1177_v17  ;;  %v1182_v24 = vor.u32 %v1448_v20, %v1179_v21  ;;  %v1353_v40 = vld [vmem:[%s2114_s4 + $0x138] sm:$0xf0]  ;;  %v1470_v50 = vld [vmem:[%s2114_s4 + $0x124] sm:$0xf]  ;;  %v1319_v63 = vld [vmem:[%s2114_s4 + $0xf0] sm:$0xf] }
 0x159   :  { %v368_v56 = vrot.slane %v367_v55, 4  ;;  %v1356_v43 = vor.u32 %v1472_v35, %v1353_v40  ;;  %v1466_v2 = vld [vmem:[%s2114_s4 + $0x104] sm:$0xf]  ;;  %v1329_v3 = vld [vmem:[%s2114_s4 + $0x108] sm:$0xf0] }
 0x15b   :  { %v369_v57 = vadd.f32 %v368_v56, %v367_v55  ;;  %664 = vmatpush.bf16.msrb.mxu3 %v1262_v29  ;;  %683 = vmatpush.bf16.msra.mxu0 %v1266_v32  ;;  %v1245_v55 = vld [vmem:[%s2114_s4 + $0x10] sm:$0xf]  ;;  %v1437_v56 = vld [vmem:[%s2114_s4 + $0x14] sm:$0xf0]  ;;  %v1474_v29 = vld [vmem:[%s2114_s4 + $0x144] sm:$0xf] }
 0x15c   :  { %571 = vmatpush.bf16.msrb.mxu2 %v1206_v52  ;;  %v1343_v32 = vld [vmem:[%s2114_s4 + $0x120] sm:$0xf]  ;;  %v1364_v33 = vor.u32 %v1474_v29, %v1361_v30 }
 0x15d   :  { %v370_v58 = vrot.slane %v369_v57, 2  ;;  %v1344_v41 = vor.u32 %v1471_v34, %v1343_v32  ;;  %v1327_v52 = vld [vmem:[%s2114_s4 + $0x100] sm:$0xf] }
 0x15f   :  { %v371_v59 = vadd.f32 %v370_v58, %v369_v57  ;;  %665 = vmatpush.bf16.msrb.mxu3 %v1254_v45  ;;  %684 = vmatpush.bf16.msra.mxu0 %v1258_v48  ;;  %v1202_v57 = vor.u32 %v1455_v53, %v1201_v51  ;;  %v1246_v58 = vor.u32 %v1437_v56, %v1245_v55  ;;  %v1345_v51 = vld [vmem:[%s2114_s4 + $0x128] sm:$0xf0]  ;;  %v1467_v56 = vld [vmem:[%s2114_s4 + $0x104] sm:$0xf0] }
 0x160   :  { %572 = vmatpush.bf16.msrb.mxu2 %v1198_v0  ;;  %v1348_v55 = vor.u32 %v1470_v50, %v1345_v51  ;;  %v1465_v0 = vld [vmem:[%s2114_s4 + $0xf4] sm:$0xf0] }
 0x161   :  { %v372_v60 = vrot.slane %v371_v59, 1  ;;  %552 = vmatpush.bf16.msrb.mxu1 %v1202_v57  ;;  %v1468_v57 = vld [vmem:[%s2114_s4 + $0x114] sm:$0xf]  ;;  %v1320_v1 = vor.u32 %v1465_v0, %v1319_v63 }
 0x163   :  { %v373_v54 = vadd.f32 %v372_v60, %v371_v59  ;;  %v1436_v59 = vld [vmem:[%s2114_s4 + $0x14] sm:$0xf]  ;;  %v1247_v60 = vld [vmem:[%s2114_s4 + $0x18] sm:$0xf0]  ;;  %666 = vmatpush.bf16.msrb.mxu3 %v1246_v58  ;;  %v1328_v58 = vor.u32 %v1467_v56, %v1327_v52 }
 0x164   :  { %573 = vmatpush.bf16.msrb.mxu2 %v1190_v12 }
 0x165   :  { %1160 = vmatmul.msk.f32.vlgmr.msrb.gmra.mxu0 %vm295_vm3, %v373_v54  ;;  %v1250_v54 = vor.u32 %v1436_v59, %v1247_v60  ;;  %553 = vmatpush.bf16.msrb.mxu1 %v1194_v4  ;;  %v1337_v59 = vld [vmem:[%s2114_s4 + $0x118] sm:$0xf0]  ;;  %v1311_v4 = vld [vmem:[%s2114_s4 + $0xe0] sm:$0xf] }
 0x166   :  { %v1312_v12 = vor.u32 %v1463_v9, %v1311_v4  ;;  %v1480_v9 = vld [vmem:[%s2116_s6 + $0x20] sm:$0xff] }
 0x167   :  { %685 = vmatpush.bf16.msra.mxu0 %v1250_v54  ;;  %667 = vmatpush.bf16.msrb.mxu3 %v1238_v5  ;;  %v1340_v54 = vor.u32 %v1468_v57, %v1337_v59 }
 0x168   :  { %574 = vmatpush.bf16.msrb.mxu2 %v1182_v24  ;;  %v1313_v24 = vld [vmem:[%s2114_s4 + $0xe8] sm:$0xf0] }
 0x169   :  { %554 = vmatpush.bf16.msrb.mxu1 %v1186_v14 }
 0x16b   :  { %686 = vmatpush.bf16.msra.mxu0 %v1242_v8  ;;  %1495 = vmatpush.bf16.msra.mxu3 %v1360_v26 }
 0x16c   :  { %814 = vmatpush.bf16.msra.mxu2 %v1364_v33 }
 0x16d   :  { %555 = vmatpush.bf16.msrb.mxu1 %v1178_v19 }
 0x16f   :  { %1496 = vmatpush.bf16.msra.mxu3 %v1352_v31 }
 0x170   :  { %815 = vmatpush.bf16.msra.mxu2 %v1356_v43 }
 0x171   :  { %795 = vmatpush.bf16.msra.mxu1 %v1360_v26 }
 0x173   :  { %1497 = vmatpush.bf16.msra.mxu3 %v1344_v41 }
 0x174   :  { %816 = vmatpush.bf16.msra.mxu2 %v1348_v55 }
 0x175   :  { %796 = vmatpush.bf16.msra.mxu1 %v1352_v31 }
 0x177   :  { %1498 = vmatpush.bf16.msra.mxu3 %v1336_v49 }
 0x178   :  { %817 = vmatpush.bf16.msra.mxu2 %v1340_v54 }
 0x179   :  { %797 = vmatpush.bf16.msra.mxu1 %v1344_v41 }
 0x17b   :  { %1499 = vmatpush.bf16.msra.mxu3 %v1328_v58 }
 0x17d   :  { %798 = vmatpush.bf16.msra.mxu1 %v1336_v49 }
 0x17f   :  { %1500 = vmatpush.bf16.msra.mxu3 %v1320_v1 }
 0x181   :  { %799 = vmatpush.bf16.msra.mxu1 %v1328_v58 }
 0x183   :  { %1501 = vmatpush.bf16.msra.mxu3 %v1312_v12 }
 0x185   :  { %800 = vmatpush.bf16.msra.mxu1 %v1320_v1  ;;  %v1482_v1 = vld [vmem:[%s2116_s6 + $0x30] sm:$0xff] }
 0x189   :  { %801 = vmatpush.bf16.msra.mxu1 %v1312_v12 }
 0x1e2   :  { %v394_v15 = vpop.f32.mrf.mxu0 }
 0x1e3   :  { %v397_v16 = vmul.f32 0.0025510204, %v394_v15 }
 0x1e5   :  { %v398_v23 = vadd.f32 1e-05, %v397_v16 }
 0x1e7   :  { %1509 = vrsqrt.f32 %v398_v23  ;;  %vm405_vm6 = vweird.f32 %v398_v23 }
 0x1ed   :  { %v1510_v42 = vpop.eup %1509 }
 0x1ee   :  { %v400_v44 = vmul.f32 %v1510_v42, %v398_v23  ;;  %vm406_vm5 = vweird.f32 %v1510_v42  ;;  %v1462_v23 = vld [vmem:[%s2114_s4 + $0xe4] sm:$0xf] }
 0x1ef   :  { %vm407_vm7 = vmor %vm405_vm6, %vm406_vm5  ;;  %v1316_v25 = vor.u32 %v1462_v23, %v1313_v24  ;;  %v1485_v23 = vld [vmem:[%s2116_s6 + $0x48] sm:$0xff]  ;;  %v1484_v24 = vld [vmem:[%s2116_s6 + $0x40] sm:$0xff] }
 0x1f0   :  { %v401_v45 = vmul.f32 %v1510_v42, %v400_v44 }
 0x1f2   :  { %v402_v48 = vmul.f32 0.5, %v401_v45 }
 0x1f4   :  { %v403_v53 = vsub.f32 1.5, %v402_v48 }
 0x1f6   :  { %v404_v60 = vmul.f32 %v1510_v42, %v403_v53 }
 0x1f8   :  { %v408_v61 = vsel %vm407_vm7, %v1510_v42, %v404_v60 }
 0x1f9   :  { %v409_v62 = vperm.slane %v408_v61, 0  ;;  %v1483_v61 = vld [vmem:[%s2116_s6 + $0x38] sm:$0xff] }
 0x1fa   :  { %997 = vmatpush.bf16.msrb.mxu0 %v1483_v61 }
 0x1fb   :  { %v410_v5 = vmul.f32 %v409_v62, %v1762_v36  ;;  %v411_v6 = vmul.f32 %v409_v62, %v1764_v37  ;;  %v412_v7 = vmul.f32 %v409_v62, %v1766_v38  ;;  %v413_v8 = vmul.f32 %v409_v62, %v1768_v39 }
 0x1fc   :  { %v1332_v36 = vor.u32 %v1466_v2, %v1329_v3  ;;  %v1324_v37 = vor.u32 %v1464_v10, %v1321_v11  ;;  %v1479_v11 = vld [vmem:[%s2116_s6 + $0x18] sm:$0xff] }
 0x1fd   :  { %vm416_vm8 = vcmp.ge.f32.partialorder %v412_v7, 0.0  ;;  %vm417_vm9 = vcmp.ge.f32.partialorder %v413_v8, 0.0  ;;  %v420_v38 = vmul.f32 0.01, %v412_v7  ;;  %v421_v39 = vmul.f32 0.01, %v413_v8 }
 0x1fe   :  { %vm414_vm10 = vcmp.ge.f32.partialorder %v410_v5, 0.0  ;;  %vm415_vm11 = vcmp.ge.f32.partialorder %v411_v6, 0.0  ;;  %v418_v13 = vmul.f32 0.01, %v410_v5  ;;  %v419_v14 = vmul.f32 0.01, %v411_v6  ;;  %818 = vmatpush.bf16.msra.mxu2 %v1332_v36  ;;  %998 = vmatpush.bf16.msrb.mxu0 %v1482_v1 }
 0x1ff   :  { %v424_v15 = vsel %vm416_vm8, %v412_v7, %v420_v38  ;;  %v425_v16 = vsel %vm417_vm9, %v413_v8, %v421_v39  ;;  %v1481_v7 = vld [vmem:[%s2116_s6 + $0x28] sm:$0xff]  ;;  %v1478_v36 = vld [vmem:[%s2116_s6 + $0x10] sm:$0xff] }
 0x200   :  { %v422_v17 = vsel %vm414_vm10, %v410_v5, %v418_v13  ;;  %v423_v18 = vsel %vm415_vm11, %v411_v6, %v419_v14  ;;  %v427_v19 = vpack.c.bf16 %v425_v16, %v424_v15  ;;  %v840_v6 = vld [vmem:[%s2115_s5] sm:$0xff]  ;;  %v1477_v39 = vld [vmem:[%s2116_s6 + $0x8] sm:$0xff] }
 0x201   :  { %v426_v20 = vpack.c.bf16 %v423_v18, %v422_v17 }
 0x202   :  { %819 = vmatpush.bf16.msra.mxu2 %v1324_v37  ;;  %v465_v22 = vshll.u32 %v427_v19, 16  ;;  %v469_v31 = vshrl.u32 %v427_v19, 16  ;;  %v716_v33 = vrot.slane %v427_v19, 1  ;;  %999 = vmatpush.bf16.msrb.mxu0 %v1481_v7 }
 0x203   :  { %1291 = vmatmul.msk.bf16.vlgmr.msrb.gmra.mxu3 %vm295_vm3, %v426_v20  ;;  %1293 = vmatmul.msk.bf16.vlgmr.msra.gmra.mxu0 %vm295_vm3, %v426_v20  ;;  %v460_v21 = vshll.u32 %v426_v20, 16  ;;  %v458_v26 = vshrl.u32 %v426_v20, 16  ;;  %v715_v34 = vrot.slane %v426_v20, 1  ;;  %v1476_v20 = vld [vmem:[%s2116_s6] sm:$0xff] }
 0x204   :  { %v467_v29 = vrot.slane %v465_v22, 1  ;;  %v1486_v22 = vld [vmem:[%s2116_s6 + $0x50] sm:$0xff] }
 0x205   :  { %v462_v27 = vrot.slane %v460_v21, 1  ;;  %v717_v35 = vsel %vm202_vm1, %v715_v34, %v716_v33  ;;  %v1487_v21 = vld [vmem:[%s2116_s6 + $0x58] sm:$0xff]  ;;  %vm1046_vm1 = vcmask 1041408  }
 0x206   :  { %820 = vmatpush.bf16.msra.mxu2 %v1316_v25  ;;  %v471_v32 = vor.u32 %v469_v31, %v467_v29  ;;  %1000 = vmatpush.bf16.msrb.mxu0 %v1480_v9  ;;  %v1024_v31 = vlaneseq }
 0x207   :  { %v463_v28 = vor.u32 %v462_v27, %v458_v26 }
 0x209   :  { %v468_v30 = vsel %vm72_vm0, %v463_v28, %v467_v29 }
 0x20a   :  { %1231 = vmatmul.msk.bf16.vlgmr.msrb.gmra.mxu1 %vm295_vm3, %v468_v30  ;;  %1233 = vmatmul.msk.bf16.vlgmr.msrb.gmra.mxu2 %vm295_vm3, %v468_v30 }
 0x20b   :  { %1001 = vmatpush.bf16.msrb.mxu0 %v1479_v11  ;;  %1014 = vmatpush.bf16.msrb.mxu1 %v1487_v21 }
 0x20f   :  { %1002 = vmatpush.bf16.msrb.mxu0 %v1478_v36  ;;  %1015 = vmatpush.bf16.msrb.mxu1 %v1486_v22 }
 0x213   :  { %1292 = vmatmul.msk.bf16.gmra.mxu3 %vm295_vm3, %v427_v19  ;;  %1294 = vmatmul.msk.bf16.gmra.mxu0 %vm295_vm3, %v427_v19 }
 0x214   :  { %1003 = vmatpush.bf16.msrb.mxu0 %v1477_v39  ;;  %1016 = vmatpush.bf16.msrb.mxu1 %v1485_v23 }
 0x218   :  { %1004 = vmatpush.bf16.msrb.mxu0 %v1476_v20  ;;  %1017 = vmatpush.bf16.msrb.mxu1 %v1484_v24 }
 0x21a   :  { %1232 = vmatmul.msk.bf16.gmra.mxu1 %vm295_vm3, %v471_v32  ;;  %1234 = vmatmul.msk.bf16.gmra.mxu2 %vm295_vm3, %v471_v32  ;;  %v1025_v32 = vand.u32 127, %v1024_v31 }
 0x21c   :  { %vm1026_vm14 = vcmp.ge.s32.totalorder %v1025_v32, 1  ;;  %vm1027_vm15 = vcmp.le.s32.totalorder %v1025_v32, 10 }
 0x21d   :  { %vm1028_vm0 = vmand %vm1026_vm14, %vm1027_vm15 }
 0x223   :  { %1366 = vmatmul.msk.bf16.vlgmr.msra.gmra.mxu3 %vm295_vm3, %v716_v33 }
 0x22a   :  { %1365 = vmatmul.msk.bf16.vlgmr.msra.gmra.mxu1 %vm295_vm3, %v717_v35  ;;  %1367 = vmatmul.msk.bf16.vlgmr.msra.gmra.mxu2 %vm295_vm3, %v717_v35 }
 0x23a   :  { %1368 = vmatmul.msk.bf16.gmra.mxu2 %vm295_vm3, %v716_v33  ;;  %v1508_v33 = vld [vmem:[%s2117_s7] ss:$0 sm:$0xff] }
 0x280   :  { %v688_v51 = vpop.f32.mrf.mxu0 }
 0x286   :  { %v669_v40 = vpop.f32.mrf.mxu3 }
 0x287   :  { %v557_v41 = vpop.f32.mrf.mxu1 }
 0x288   :  { %v690_v59 = vpop.f32.mrf.mxu0  ;;  %v670_v2 = vadd.f32 %v669_v40, %v557_v41  ;;  %v1041_v40 = vld [vmem:[%s2119_s9] sm:$0xff]  ;;  %s1062_s9 = sshll.u32 %s1573_s30, 4  ;;  %s1063_s9 = int_to_ptr.vmem [resolvable:$true] %s1062_s9 }
 0x28d   :  { %v576_v42 = vpop.f32.mrf.mxu2 }
 0x28e   :  { %v671_v43 = vpop.f32.mrf.mxu3  ;;  %v689_v17 = vadd.f32 %v688_v51, %v576_v42 }
 0x28f   :  { %v559_v44 = vpop.f32.mrf.mxu1 }
 0x290   :  { %v672_v63 = vadd.f32 %v671_v43, %v559_v44  ;;  %v693_v8 = vpop.f32.mrf.mxu0 }
 0x295   :  { %v578_v45 = vpop.f32.mrf.mxu2 }
 0x296   :  { %v674_v46 = vpop.f32.mrf.mxu3  ;;  %v691_v15 = vadd.f32 %v690_v59, %v578_v45 }
 0x297   :  { %v562_v47 = vpop.f32.mrf.mxu1 }
 0x298   :  { %v675_v60 = vadd.f32 %v674_v46, %v562_v47  ;;  %v695_v12 = vpop.f32.mrf.mxu0 }
 0x29d   :  { %v581_v48 = vpop.f32.mrf.mxu2 }
 0x29e   :  { %v676_v49 = vpop.f32.mrf.mxu3  ;;  %v694_v13 = vadd.f32 %v693_v8, %v581_v48 }
 0x29f   :  { %v564_v50 = vpop.f32.mrf.mxu1 }
 0x2a0   :  { %v677_v56 = vadd.f32 %v676_v49, %v564_v50 }
 0x2a5   :  { %v583_v52 = vpop.f32.mrf.mxu2 }
 0x2a6   :  { %v808_v53 = vpop.f32.mrf.mxu3  ;;  %v696_v37 = vadd.f32 %v695_v12, %v583_v52 }
 0x2a7   :  { %v803_v55 = vpop.f32.mrf.mxu1  ;;  %v836_v0 = vadd.f32 %v808_v53, %v675_v60 }
 0x2a8   :  { %v832_v4 = vadd.f32 %v803_v55, %v670_v2 }
 0x2ad   :  { %v822_v57 = vpop.f32.mrf.mxu2 }
 0x2ae   :  { %v810_v58 = vpop.f32.mrf.mxu3  ;;  %v833_v19 = vadd.f32 %v822_v57, %v689_v17 }
 0x2af   :  { %v838_v54 = vadd.f32 %v810_v58, %v677_v56  ;;  %v805_v62 = vpop.f32.mrf.mxu1 }
 0x2b0   :  { %v834_v3 = vadd.f32 %v805_v62, %v672_v63 }
 0x2b1   :  { %1369 = vmatpush.msk.msrb.mxu3 %vm845_vm12, %v838_v54 }
 0x2b3   :  { %865 = vmatpush.msrb.mxu3 %v836_v0 }
 0x2b5   :  { %v824_v5 = vpop.f32.mrf.mxu2  ;;  %866 = vmatpush.msrb.mxu3 %v834_v3 }
 0x2b6   :  { %v835_v18 = vadd.f32 %v824_v5, %v691_v15 }
 0x2b7   :  { %867 = vmatpush.msrb.mxu3 %v832_v4 }
 0x2b8   :  { %1370 = vmatmul.msk.f32.vlgmr.msrb.gmra.mxu3 %vm841_vm13, %v840_v6 }
 0x2bd   :  { %v827_v10 = vpop.f32.mrf.mxu2 }
 0x2be   :  { %v837_v16 = vadd.f32 %v827_v10, %v694_v13 }
 0x2c5   :  { %v829_v38 = vpop.f32.mrf.mxu2 }
 0x2c6   :  { %v839_v14 = vadd.f32 %v829_v38, %v696_v37 }
 0x2c8   :  { %1371 = vmatpush.msk.msra.mxu3 %vm845_vm12, %v839_v14 }
 0x2ca   :  { %885 = vmatpush.msra.mxu3 %v837_v16 }
 0x2cc   :  { %886 = vmatpush.msra.mxu3 %v835_v18 }
 0x2ce   :  { %887 = vmatpush.msra.mxu3 %v833_v19 }
 0x2cf   :  { %1372 = vmatmul.msk.f32.vlgmr.msra.gmra.mxu3 %vm841_vm13, %v840_v6 }
 0x33b   :  { %v869_v25 = vpop.f32.mrf.mxu3 }
 0x33c   :  { %v892_v26 = vpack.c.bf16 %v869_v25, %v869_v25 }
 0x33e   :  { %1005 = vmatmul.bf16.vlgmr.msrb.gmra.mxu0 %v892_v26 }
 0x352   :  { %v889_v27 = vpop.f32.mrf.mxu3 }
 0x353   :  { %v893_v28 = vpack.c.bf16 %v889_v27, %v889_v27 }
 0x355   :  { %1421 = vmatmul.msk.bf16.vlgmr.msrb.gmra.mxu1 %vm112_vm2, %v893_v28  ;;  %vm1055_vm2 = vcmask 0  }
 0x3bb   :  { %v1006_v29 = vpop.f32.mrf.mxu0 }
 0x3bc   :  { %v1007_v34 = vadd.f32 %v1508_v33, %v1006_v29 }
 0x3c3   :  { %v1008_v30 = vpop.f32.mrf.mxu0 }
 0x3d2   :  { %v1019_v35 = vpop.f32.mrf.mxu1 }
 0x3d3   :  { %v1020_v41 = vadd.f32 %v1019_v35, %v1007_v34 }
 0x3d5   :  { %1023 = vst [vmem:[#allocation2] sm:$0xff] %v1020_v41  ;;  %v1029_v42 = vsel %vm1028_vm0, %v1020_v41, -1e+30  ;;  %v1042_v43 = vmul.f32 %v1041_v40, %v1020_v41 }
 0x3d6   :  { %1030 = vmax.xlane.f32.xlu2 %v1029_v42  ;;  %1067 = dma.vmem_to_hbm [thread:$0]  %s1063_s9, 128, %s1065_s29, [#allocation3]  }
 0x3d7   :  { %1043 = vadd.xlane.f32.xlu0 %v1042_v43 }
 0x3da   :  { %v1021_v44 = vpop.f32.mrf.mxu1 }
 0x449   :  { %v1031_v45 = vpop.xlane.xlu2 %1030 }
 0x44a   :  { %v1032_v46 = vsub.f32 %v1020_v41, %v1031_v45  ;;  %v1044_v55 = vpop.xlane.xlu0 %1043 }
 0x44c   :  { %v1033_v47 = vmul.f32 1.442695, %v1032_v46 }
 0x44e   :  { %1511 = vpow2.f32 %v1033_v47 }
 0x454   :  { %v1512_v48 = vpop.eup %1511 }
 0x455   :  { %v1035_v49 = vsel %vm1028_vm0, %v1512_v48, 0.0 }
 0x456   :  { %1036 = vadd.xlane.f32.xlu2 %v1035_v49 }
 0x4c9   :  { %v1037_v50 = vpop.xlane.xlu2 %1036 }
 0x4ca   :  { %1513 = vlog2.f32 %v1037_v50 }
 0x4d0   :  { %v1514_v51 = vpop.eup %1513 }
 0x4d1   :  { %v1039_v52 = vmul.f32 0.6931472, %v1514_v51 }
 0x4d3   :  { %v1040_v53 = vadd.f32 %v1039_v52, %v1031_v45 }
 0x4d5   :  { %v1045_v56 = vsub.f32 %v1040_v53, %v1044_v55 }
 0x4d7   :  { %v1047_v57 = vsel %vm1046_vm1, %v1045_v56, 0.0 }
 0x4d8   :  { %v1048_v58 = vrot.slane %v1047_v57, 4 }
 0x4da   :  { %v1049_v59 = vadd.f32 %v1048_v58, %v1047_v57 }
 0x4dc   :  { %v1050_v60 = vrot.slane %v1049_v59, 2 }
 0x4de   :  { %v1051_v54 = vadd.f32 %v1050_v60, %v1049_v59 }
 0x4e0   :  { %v1052_v61 = vrot.slane %v1051_v54, 1 }
 0x4e2   :  { %v1053_v62 = vadd.f32 %v1052_v61, %v1051_v54 }
 0x4e4   :  { %v1054_v63 = vmul.f32 0.5, %v1053_v62 }
 0x4e6   :  { %1056 = vst.msk [vmem:[#allocation4] sm:$0x1] %vm1055_vm2, %v1054_v63 }
 0x4e7   :  { %1078 = dma.vmem_to_hbm [thread:$0]  %s1074_s12, 16, %s1076_s15, [#allocation5]  }
 0x4e8   :  { %1567 = dma.done.wait [#allocation3], 128  }
 0x4e9   :  { %1568 = vsyncadd [#allocation3], 4294967168 }
 0x4ea   :  { %1569 = dma.done.wait [#allocation5], 16  }
 0x4eb   :  { %1570 = vsyncadd [#allocation5], 4294967280 }
 0x4ec   :  { %1087 = vsyncpa [#allocation3], 1 }
 0x4ed   :  { %1088 = vsyncpa [#allocation5], 1 }

</bundles_post_ra>
